<compile_context>
chip_gen: v5e
topology: v5e:2x2
jax: 0.10.0
libtpu: 0.0.40
codegen_flags: <defaults>
</compile_context>

<pallas_src>
import functools

import jax
import jax.numpy as jnp
from jax.experimental import pallas as pl
from jax.experimental.pallas import tpu as pltpu


def _kldiv_tile_kernel(yp_ref, y_ref, o_ref, *, batch, tb):
    # One (TB, C) batch tile of logits and target probabilities.
    yp = yp_ref[...].astype(jnp.float32)
    y = y_ref[...].astype(jnp.float32)

    # log_softmax over the class axis (dim=1), numerically stable.
    m = jnp.max(yp, axis=1, keepdims=True)
    z = yp - m
    lse = jnp.log(jnp.sum(jnp.exp(z), axis=1, keepdims=True))
    logp = z - lse

    # Mask rows past the true batch size (last tile may be padded).
    row = jax.lax.broadcasted_iota(jnp.int32, (tb, 1), 0) + pl.program_id(0) * tb
    valid = row < batch

    # PyTorch kl_div pointwise: target * (log(target) - input), with the
    # xlogy convention 0 * log(0) = 0. Masked rows contribute exactly 0.
    safe_y = jnp.where(y > 0, y, 1.0)
    pointwise = jnp.where((y > 0) & valid, y * (jnp.log(safe_y) - logp), 0.0)

    # Per-row partial sums only; the final scalar collapse (and /B) is done
    # once in the wrapper, not per grid step.
    o_ref[...] = jnp.sum(pointwise, axis=1, keepdims=True)


def _round_up(x, m):
    return ((x + m - 1) // m) * m


def _pick_tb(B, C):
    # 2 inputs x 2 pipeline buffers x TB x C x 4B must stay well under the
    # smallest scoped-VMEM budget across generations (v7x: 64 MiB physical,
    # 32 MiB default scoped). Target ~32 MiB of tile data.
    data_budget = 32 * 1024 * 1024
    tb = data_budget // (2 * 2 * C * 4)
    tb = max(8, min(tb, 512))            # measured sweet spot is a few hundred rows
    tb = min(tb, _round_up(B, 8))        # never bigger than the (padded) batch
    tb = max(8, (tb // 8) * 8)           # keep the sublane axis a multiple of 8
    return int(tb)


def kldiv_loss(y_pred, y, *, tb=None):
    """Pallas equivalent of LossFunction.forward(y_pred, y). Inputs: (B, C)."""
    B, C = y_pred.shape
    if tb is None:
        tb = _pick_tb(B, C)
    num_tiles = pl.cdiv(B, tb)

    # Raise the scoped VMEM limit enough for the double-buffered tiles
    # (v5e defaults to 16 MiB); stay below v7x's 64 MiB physical VMEM.
    data_bytes = 2 * 2 * tb * C * 4 + 2 * tb * 4
    vmem_limit = int(min(max(data_bytes + (4 << 20), 16 << 20), 48 << 20))

    kernel = functools.partial(_kldiv_tile_kernel, batch=B, tb=tb)

    partials = pl.pallas_call(
        kernel,
        out_shape=jax.ShapeDtypeStruct((num_tiles * tb, 1), jnp.float32),
        grid_spec=pltpu.PrefetchScalarGridSpec(
            num_scalar_prefetch=0,
            grid=(num_tiles,),
            in_specs=[
                pl.BlockSpec((tb, C), lambda i: (i, 0)),
                pl.BlockSpec((tb, C), lambda i: (i, 0)),
            ],
            out_specs=pl.BlockSpec((tb, 1), lambda i: (i, 0)),
        ),
        compiler_params=pltpu.CompilerParams(
            dimension_semantics=("parallel",),
            vmem_limit_bytes=vmem_limit,
        ),
    )(y_pred, y)

    # batchmean: sum over all elements, scaled by a compile-time 1/B multiply.
    return jnp.sum(partials) * (1.0 / B)


def _reference(y_pred, y):
    # Pure-JAX reference for a sanity check.
    logp = jax.nn.log_softmax(y_pred.astype(jnp.float32), axis=1)
    y = y.astype(jnp.float32)
    pw = jnp.where(y > 0, y * (jnp.log(jnp.where(y > 0, y, 1.0)) - logp), 0.0)
    return jnp.sum(pw) / y_pred.shape[0]


if __name__ == "__main__":
    key = jax.random.PRNGKey(0)
    k1, k2 = jax.random.split(key)

    B, C = 20, 32  # small shapes; B deliberately not a multiple of the tile size
    y_pred = jax.random.normal(k1, (B, C), dtype=jnp.float32)          # raw logits
    y_logits = jax.random.normal(k2, (B, C), dtype=jnp.float32)
    y = jax.nn.softmax(y_logits, axis=1)                               # target probs

    ref = _reference(y_pred, y)

    # Default tile size (single, edge-padded tile).
    loss = kldiv_loss(y_pred, y)
    jax.block_until_ready(loss)
    assert jnp.allclose(loss, ref, rtol=1e-5, atol=1e-5), (loss, ref)

    # Force multiple batch tiles to exercise the pipelined + masked-row path.
    loss_tiled = kldiv_loss(y_pred, y, tb=8)
    jax.block_until_ready(loss_tiled)
    assert jnp.allclose(loss_tiled, ref, rtol=1e-5, atol=1e-5), (loss_tiled, ref)

    print("KERNEL_OK")
</pallas_src>

<mosaic_0001>
module attributes {stable_mosaic.version = 11 : i64} {
  func.func @_kldiv_tile_kernel(%arg0: i32, %arg1: memref<24x32xf32, #tpu.memory_space<vmem>>, %arg2: memref<24x32xf32, #tpu.memory_space<vmem>>, %arg3: memref<24x1xf32, #tpu.memory_space<vmem>>) attributes {dimension_semantics = [#tpu.dimension_semantics<parallel>], iteration_bounds = array<i64: 1>, scalar_prefetch = 0 : i64, scratch_operands = 0 : i64, tpu.core_type = #tpu.core_type<tc>, window_params = [{transform_indices = @transform_0, window_bounds = array<i64: 24, 32>}, {transform_indices = @transform_1, window_bounds = array<i64: 24, 32>}, {transform_indices = @transform_2, window_bounds = array<i64: 24, 1>}]} {
    %c0 = arith.constant 0 : index
    %c0_0 = arith.constant 0 : index
    %0 = vector.load %arg1[%c0, %c0_0] : memref<24x32xf32, #tpu.memory_space<vmem>>, vector<24x32xf32>
    %c0_1 = arith.constant 0 : index
    %c0_2 = arith.constant 0 : index
    %1 = vector.load %arg2[%c0_1, %c0_2] : memref<24x32xf32, #tpu.memory_space<vmem>>, vector<24x32xf32>
    %cst = arith.constant dense<0xFF800000> : vector<24xf32>
    %2 = vector.multi_reduction <maximumf>, %0, %cst [1] : vector<24x32xf32> to vector<24xf32>
    %3 = vector.shape_cast %2 : vector<24xf32> to vector<24x1xf32>
    %4 = vector.broadcast %3 : vector<24x1xf32> to vector<24x32xf32>
    %5 = arith.subf %0, %4 : vector<24x32xf32>
    %6 = math.exp %5 : vector<24x32xf32>
    %cst_3 = arith.constant dense<0.000000e+00> : vector<24xf32>
    %7 = vector.multi_reduction <add>, %6, %cst_3 [1] : vector<24x32xf32> to vector<24xf32>
    %8 = vector.shape_cast %7 : vector<24xf32> to vector<24x1xf32>
    %9 = math.log %8 : vector<24x1xf32>
    %10 = vector.broadcast %9 : vector<24x1xf32> to vector<24x32xf32>
    %11 = arith.subf %5, %10 : vector<24x32xf32>
    %12 = tpu.iota {dimensions = array<i32: 0>} : vector<24x1xi32>
    %c24_i32 = arith.constant 24 : i32
    %13 = arith.muli %arg0, %c24_i32 : i32
    %14 = vector.broadcast %13 : i32 to vector<24x1xi32>
    %15 = arith.addi %12, %14 : vector<24x1xi32>
    %c20_i32 = arith.constant 20 : i32
    %16 = vector.broadcast %c20_i32 : i32 to vector<24x1xi32>
    %17 = arith.cmpi slt, %15, %16 : vector<24x1xi32>
    %cst_4 = arith.constant 0.000000e+00 : f32
    %18 = vector.broadcast %cst_4 : f32 to vector<24x32xf32>
    %19 = arith.cmpf ogt, %1, %18 : vector<24x32xf32>
    %cst_5 = arith.constant 1.000000e+00 : f32
    %20 = vector.broadcast %cst_5 : f32 to vector<24x32xf32>
    %21 = arith.select %19, %1, %20 : vector<24x32xi1>, vector<24x32xf32>
    %cst_6 = arith.constant 0.000000e+00 : f32
    %22 = vector.broadcast %cst_6 : f32 to vector<24x32xf32>
    %23 = arith.cmpf ogt, %1, %22 : vector<24x32xf32>
    %24 = vector.broadcast %17 : vector<24x1xi1> to vector<24x32xi1>
    %25 = arith.andi %23, %24 : vector<24x32xi1>
    %26 = math.log %21 : vector<24x32xf32>
    %27 = arith.subf %26, %11 : vector<24x32xf32>
    %28 = arith.mulf %1, %27 : vector<24x32xf32>
    %cst_7 = arith.constant 0.000000e+00 : f32
    %29 = vector.broadcast %cst_7 : f32 to vector<24x32xf32>
    %30 = arith.select %25, %28, %29 : vector<24x32xi1>, vector<24x32xf32>
    %cst_8 = arith.constant dense<0.000000e+00> : vector<24xf32>
    %31 = vector.multi_reduction <add>, %30, %cst_8 [1] : vector<24x32xf32> to vector<24xf32>
    %32 = vector.shape_cast %31 : vector<24xf32> to vector<24x1xf32>
    %c0_9 = arith.constant 0 : index
    %c0_10 = arith.constant 0 : index
    %33 = vector.load %arg3[%c0_9, %c0_10] : memref<24x1xf32, #tpu.memory_space<vmem>>, vector<24x1xf32>
    tpu.vector_store %arg3[%c0_9, %c0_10], %32 {strides = array<i32>} : memref<24x1xf32, #tpu.memory_space<vmem>>, vector<24x1xf32>,
    return
  }
  func.func @transform_0(%arg0: i32) -> (i32, i32) {
    %c0_i32 = arith.constant 0 : i32
    %c0_i32_0 = arith.constant 0 : i32
    return %arg0, %c0_i32 : i32, i32
  }
  func.func @transform_1(%arg0: i32) -> (i32, i32) {
    %c0_i32 = arith.constant 0 : i32
    %c0_i32_0 = arith.constant 0 : i32
    return %arg0, %c0_i32 : i32, i32
  }
  func.func @transform_2(%arg0: i32) -> (i32, i32) {
    %c0_i32 = arith.constant 0 : i32
    %c0_i32_0 = arith.constant 0 : i32
    return %arg0, %c0_i32 : i32, i32
  }
}

</mosaic_0001>

<bundles_post_ra>
// kernel: tpu_custom_call.1
= control target key start
LH: loop header
LB: loop body
LE: loop exit
PB: predicated region body
PF: predicated region fallthrough
CT: control target
= control target key end

     0   :  { %7 = vsyncpa [#allocation3], 0  ;;  %s270_s0 = inlined_call_operand.hbm [shape: f32[20,32], index: 0, kind: input, shape index: {}]   ;;  %s271_s1 = inlined_call_operand.hbm [shape: f32[20,32], index: 1, kind: input, shape index: {}]   ;;  %s272_s2 = inlined_call_operand.vmem [shape: f32[24,1], index: 2, kind: output, shape index: {}]  }
   0x1   :  { %s13_s11 = sshll.u32 %s270_s0, 4  ;;  %s14_s11 = int_to_ptr.hbm [resolvable:$true] %s13_s11 }
   0x2   :  { %8 = vsyncpa [#allocation5], 0  ;;  %s221_s12 = smov [#allocation2]   ;;  %s26_s16 = sshll.u32 %s271_s1, 4  ;;  %s27_s16 = int_to_ptr.hbm [resolvable:$true] %s26_s16 }
   0x3   :  { %s15_s13 = sshll.u32 %s221_s12, 4  ;;  %s222_s17 = smov 128   ;;  %s16_s13 = int_to_ptr.vmem [resolvable:$true] %s15_s13 }
   0x4   :  { %s223_s18 = smov 8   ;;  %s224_s19 = smov [#allocation4]  }
   0x5   :  { %21 = dma.hbm_to_vmem [thread:$0]  %s14_s11, 384, %s16_s13, [#allocation3], %s222_s17, %s222_s17, %s223_s18  }
   0x6   :  { %s28_s20 = sshll.u32 %s224_s19, 4  ;;  %s29_s20 = int_to_ptr.vmem [resolvable:$true] %s28_s20 }
   0x7   :  { %34 = dma.hbm_to_vmem [thread:$0]  %s27_s16, 384, %s29_s20, [#allocation5], %s222_s17, %s222_s17, %s223_s18  }
   0x8   :  { %217 = dma.done.wait [#allocation3], 384  }
   0x9   :  { %218 = vsyncadd [#allocation3], 4294966912 }
   0xa   :  { %219 = dma.done.wait [#allocation5], 384  }
   0xb   :  { %220 = vsyncadd [#allocation5], 4294966912  ;;  %vm49_vm0 = vcmask 261120   ;;  %v43_v0 = vld [vmem:[#allocation2] sm:$0xff]  ;;  %v45_v1 = vld [vmem:[#allocation2 + $0x10] sm:$0xff]  ;;  %v86_v37 = vlaneseq  ;;  %vm137_vm6 = vcmask 7168  }
   0xc   :  { %v50_v2 = vsel %vm49_vm0, %v43_v0, -inf  ;;  %v56_v3 = vsel %vm49_vm0, %v45_v1, -inf  ;;  %v44_v4 = vld [vmem:[#allocation2 + $0x8] sm:$0xff]  ;;  %v46_v21 = vld [vmem:[#allocation4] sm:$0xff]  ;;  %v47_v23 = vld [vmem:[#allocation4 + $0x8] sm:$0xff] }
   0xd   :  { %51 = vmax.xlane.f32.xlu0 %v50_v2  ;;  %57 = vmax.xlane.f32.xlu1 %v56_v3  ;;  %v53_v5 = vsel %vm49_vm0, %v44_v4, -inf  ;;  %vm98_vm1 = vcmp.gt.f32.partialorder %v46_v21, 0.0  ;;  %vm99_vm2 = vcmp.gt.f32.partialorder %v47_v23, 0.0  ;;  %v48_v27 = vld [vmem:[#allocation4 + $0x10] sm:$0xff]  ;;  %v87_v45 = vshrl.u32 %v86_v37, 7 }
   0xe   :  { %v101_v22 = vsel %vm98_vm1, %v46_v21, 1.0  ;;  %v102_v25 = vsel %vm99_vm2, %v47_v23, 1.0  ;;  %vm100_vm3 = vcmp.gt.f32.partialorder %v48_v27, 0.0 }
   0xf   :  { %v103_v34 = vsel %vm100_vm3, %v48_v27, 1.0  ;;  %v89_v49 = vadd.s32 16, %v87_v45 }
  0x11   :  { %vm97_vm4 = vcmp.lt.s32.totalorder %v89_v49, 20 }
  0x12   :  { %vm112_vm5 = vmand %vm100_vm3, %vm97_vm4 }
  0x15   :  { %54 = vmax.xlane.f32.xlu0 %v53_v5 }
  0x80   :  { %v52_v6 = vpop.xlane.xlu0 %51  ;;  %v58_v9 = vpop.xlane.xlu1 %57 }
  0x81   :  { %v59_v7 = vsub.f32 %v43_v0, %v52_v6  ;;  %v61_v12 = vsub.f32 %v45_v1, %v58_v9 }
  0x83   :  { %v62_v8 = vmul.f32 1.442695, %v59_v7  ;;  %v66_v16 = vmul.f32 1.442695, %v61_v12 }
  0x85   :  { %151 = vpow2.f32 %v62_v8 }
  0x88   :  { %v55_v10 = vpop.xlane.xlu0 %54 }
  0x89   :  { %v60_v11 = vsub.f32 %v44_v4, %v55_v10 }
  0x8b   :  { %v152_v13 = vpop.eup %151  ;;  %v64_v14 = vmul.f32 1.442695, %v60_v11 }
  0x8c   :  { %v68_v15 = vsel %vm49_vm0, %v152_v13, 0.0 }
  0x8d   :  { %153 = vpow2.f32 %v64_v14  ;;  %69 = vadd.xlane.f32.xlu1 %v68_v15 }
  0x8e   :  { %155 = vpow2.f32 %v66_v16 }
  0x8f   :  { %157 = vlog2.f32 %v101_v22 }
  0x93   :  { %v154_v17 = vpop.eup %153 }
  0x94   :  { %v71_v18 = vsel %vm49_vm0, %v154_v17, 0.0  ;;  %v156_v19 = vpop.eup %155 }
  0x95   :  { %72 = vadd.xlane.f32.xlu2 %v71_v18  ;;  %v74_v20 = vsel %vm49_vm0, %v156_v19, 0.0  ;;  %v158_v26 = vpop.eup %157 }
  0x96   :  { %v114_v31 = vmul.f32 0.6931472, %v158_v26 }
  0x9d   :  { %75 = vadd.xlane.f32.xlu2 %v74_v20 }
 0x100   :  { %v70_v24 = vpop.xlane.xlu1 %69 }
 0x101   :  { %159 = vlog2.f32 %v70_v24 }
 0x102   :  { %161 = vlog2.f32 %v102_v25 }
 0x107   :  { %v160_v28 = vpop.eup %159 }
 0x108   :  { %v78_v29 = vmul.f32 0.6931472, %v160_v28  ;;  %v73_v30 = vpop.xlane.xlu2 %72  ;;  %v162_v35 = vpop.eup %161 }
 0x109   :  { %163 = vlog2.f32 %v73_v30  ;;  %v116_v42 = vmul.f32 0.6931472, %v162_v35 }
 0x10a   :  { %v83_v32 = vsub.f32 %v59_v7, %v78_v29  ;;  %165 = vlog2.f32 %v103_v34 }
 0x10c   :  { %v119_v33 = vsub.f32 %v114_v31, %v83_v32 }
 0x10e   :  { %v122_v36 = vmul.f32 %v119_v33, %v46_v21 }
 0x10f   :  { %v164_v38 = vpop.eup %163 }
 0x110   :  { %v80_v39 = vmul.f32 0.6931472, %v164_v38  ;;  %v76_v40 = vpop.xlane.xlu2 %75  ;;  %v125_v41 = vsel %vm98_vm1, %v122_v36, 0.0  ;;  %v166_v47 = vpop.eup %165 }
 0x111   :  { %167 = vlog2.f32 %v76_v40  ;;  %v128_v43 = vsel %vm49_vm0, %v125_v41, 0.0  ;;  %v118_v53 = vmul.f32 0.6931472, %v166_v47 }
 0x112   :  { %v84_v44 = vsub.f32 %v60_v11, %v80_v39  ;;  %129 = vadd.xlane.f32.xlu0 %v128_v43 }
 0x114   :  { %v120_v46 = vsub.f32 %v116_v42, %v84_v44 }
 0x116   :  { %v123_v48 = vmul.f32 %v120_v46, %v47_v23 }
 0x117   :  { %v168_v50 = vpop.eup %167 }
 0x118   :  { %v82_v51 = vmul.f32 0.6931472, %v168_v50  ;;  %v126_v52 = vsel %vm99_vm2, %v123_v48, 0.0 }
 0x119   :  { %v131_v54 = vsel %vm49_vm0, %v126_v52, 0.0 }
 0x11a   :  { %v85_v55 = vsub.f32 %v61_v12, %v82_v51  ;;  %132 = vadd.xlane.f32.xlu1 %v131_v54 }
 0x11c   :  { %v121_v56 = vsub.f32 %v118_v53, %v85_v55 }
 0x11e   :  { %v124_v57 = vmul.f32 %v121_v56, %v48_v27 }
 0x120   :  { %v127_v58 = vsel %vm112_vm5, %v124_v57, 0.0 }
 0x121   :  { %v134_v59 = vsel %vm49_vm0, %v127_v58, 0.0 }
 0x122   :  { %135 = vadd.xlane.f32.xlu2 %v134_v59 }
 0x185   :  { %v130_v60 = vpop.xlane.xlu0 %129 }
 0x186   :  { %138 = vst.msk [vmem:[%s272_s2] sm:$0xff] %vm137_vm6, %v130_v60 }
 0x18d   :  { %v133_v61 = vpop.xlane.xlu1 %132 }
 0x18e   :  { %139 = vst.msk [vmem:[%s272_s2 + $0x8] sm:$0xff] %vm137_vm6, %v133_v61 }
 0x195   :  { %v136_v62 = vpop.xlane.xlu2 %135 }
 0x196   :  { %140 = vst.msk [vmem:[%s272_s2 + $0x10] sm:$0xff] %vm137_vm6, %v136_v62 }
 0x197   :  { %145 = vsyncpa [#allocation3], 1 }
 0x198   :  { %146 = vsyncpa [#allocation5], 1 }

</bundles_post_ra>
